<compile_context>
chip_gen: v6e
topology: v6e:2x2x1
jax: 0.10.0
libtpu: 0.0.40
codegen_flags: <defaults>
</compile_context>

<pallas_src>
import functools
import math

import numpy as np

import jax
import jax.numpy as jnp
from jax import lax
from jax.experimental import pallas as pl
from jax.experimental.pallas import tpu as pltpu


# --------------------------------------------------------------------------
# Prologue kernel: normalize both views, fold in 1/sqrt(T), emit positives.
# --------------------------------------------------------------------------
def _prep_kernel(emb_i_ref, emb_j_ref, z2_ref, pos_ref, *, inv_temp):
    inv_sqrt_t = math.sqrt(inv_temp)

    def normalize_scaled(x):
        # F.normalize(x, dim=1, eps=1e-12), scaled by 1/sqrt(T) so that the
        # Gram products in the main kernel are already logits (= cosine / T).
        sq = jnp.sum(x * x, axis=1, keepdims=True)
        return x * (lax.rsqrt(jnp.maximum(sq, 1e-24)) * inv_sqrt_t)

    zi = normalize_scaled(emb_i_ref[...])            # (N, D) f32
    zj = normalize_scaled(emb_j_ref[...])            # (N, D) f32
    z2_ref[0] = zi.astype(z2_ref.dtype)
    z2_ref[1] = zj.astype(z2_ref.dtype)
    # Positive logits z_i[k].z_j[k]/T (identical for both directions), in f32.
    pos_ref[...] = jnp.sum(zi * zj, axis=1, keepdims=True)


# --------------------------------------------------------------------------
# Main kernel: one upper-triangular (row-block, col-block) Gram tile per step.
# --------------------------------------------------------------------------
def _ntxent_kernel(a_ref, b_ref, z_ref, pos_ref, loss_ref, denom_ref, *,
                   tb, two_n, inv_temp):
    t = pl.program_id(0)

    @pl.when(t == 0)
    def _init():
        denom_ref[...] = jnp.zeros_like(denom_ref)

    a = a_ref[t]                                     # row-block index
    b = b_ref[t]                                     # col-block index (b >= a)

    za = z_ref[pl.ds(pl.multiple_of(a * tb, tb), tb), :]    # (TB, D)
    zb = z_ref[pl.ds(pl.multiple_of(b * tb, tb), tb), :]    # (TB, D)

    # A @ B.T without materializing a transpose: contract dim 1 of both.
    dn = (((1,), (1,)), ((), ()))
    s = lax.dot_general(za, zb, dn,
                        preferred_element_type=jnp.float32)  # (TB, TB) logits

    # Exclude the true diagonal (exact, handles zero-norm rows) and padded
    # rows/cols; pre-shift by the static bound 1/T so exp never overflows.
    rows = a * tb + lax.broadcasted_iota(jnp.int32, (tb, tb), 0)
    cols = b * tb + lax.broadcasted_iota(jnp.int32, (tb, tb), 1)
    valid = (rows < two_n) & (cols < two_n) & (rows != cols)
    e = jnp.where(valid, jnp.exp(s - inv_temp), 0.0)          # (TB, TB) f32

    # Row sums produced lane-dense ((1, TB)) on the (otherwise idle) MXU so
    # the accumulator update needs no transpose / relayout.
    ones_rows = jnp.ones((8, tb), jnp.float32)
    row_sums = lax.dot_general(
        ones_rows, e, dn, preferred_element_type=jnp.float32)[0:1, :]
    denom_ref[pl.ds(a, 1), :] += row_sums

    @pl.when(a != b)
    def _mirror():
        # By symmetry S[b-rows, a-cols] = S[a-rows, b-cols]^T, so the column
        # sums of this block are the missing contributions to block b's rows.
        col_sums = jnp.sum(e, axis=0, keepdims=True)          # (1, TB)
        denom_ref[pl.ds(b, 1), :] += col_sums

    @pl.when(t == pl.num_programs(0) - 1)
    def _finalize():
        d = denom_ref[...]                                    # (nb, TB)
        gid = (lax.broadcasted_iota(jnp.int32, d.shape, 0) * tb
               + lax.broadcasted_iota(jnp.int32, d.shape, 1))
        d = jnp.where(gid < two_n, d, 1.0)                    # padded -> log 1 = 0
        # log(denominator) = log(sum exp(logit - 1/T)) + 1/T for each real row.
        total_log = jnp.sum(jnp.log(d)) + jnp.float32(two_n * inv_temp)
        pos_sum = jnp.sum(pos_ref[...])
        loss_ref[0, 0] = (total_log - 2.0 * pos_sum) / jnp.float32(two_n)


# --------------------------------------------------------------------------
# Wrapper.
# --------------------------------------------------------------------------
def _pick_block(two_n, max_tb=256):
    """Row/col block size over the 2N keys; pad-and-mask handles the rest."""
    if two_n <= 2 * max_tb:
        tb = min(((two_n + 7) // 8) * 8, 2 * max_tb)   # single / few blocks
    else:
        tb = max_tb                                    # MXU-friendly tile
    nb = -(-two_n // tb)
    return tb, nb


def _vmem_limit_bytes(r, d_dim, tb, nb, md):
    lane = 128
    d_pad = -(-d_dim // lane) * lane
    tb_pad = -(-tb // lane) * lane
    itemsize = jnp.dtype(md).itemsize
    z_bytes = 2 * r * d_pad * itemsize            # resident key slab (x2 buffers)
    tile_bytes = 6 * tb * tb_pad * 4              # s / e / mask temporaries
    denom_bytes = max(nb, 8) * tb_pad * 4
    need = z_bytes + tile_bytes + denom_bytes + (4 << 20)
    try:
        cap = pltpu.get_tpu_info().vmem_capacity_bytes
    except Exception:  # conservative fallback = v7x's 64 MiB
        cap = 64 << 20
    return int(min(max(need, 16 << 20), (cap * 3) // 4))


def contrastive_loss_eli5(emb_i, emb_j, *, temperature=0.5,
                          matmul_dtype=jnp.bfloat16):
    """Pallas implementation of ContrastiveLossELI5.forward (returns scalar)."""
    assert emb_i.shape == emb_j.shape and emb_i.ndim == 2
    n, d = emb_i.shape
    two_n = 2 * n
    inv_temp = 1.0 / float(temperature)
    emb_i = emb_i.astype(jnp.float32)
    emb_j = emb_j.astype(jnp.float32)

    # --- prologue: normalize + scale + positives (raw inputs touched once) ---
    z2, pos = pl.pallas_call(
        functools.partial(_prep_kernel, inv_temp=inv_temp),
        out_shape=(jax.ShapeDtypeStruct((2, n, d), matmul_dtype),
                   jax.ShapeDtypeStruct((n, 1), jnp.float32)),
    )(emb_i, emb_j)

    # --- layout plumbing: fused (R, D) key slab, zero-padded to the block ---
    tb, nb = _pick_block(two_n)
    r = tb * nb
    z_all = z2.reshape(two_n, d)
    if r != two_n:
        z_all = jnp.pad(z_all, ((0, r - two_n), (0, 0)))

    # --- upper-triangular (row-block, col-block) schedule, scalar-prefetched ---
    ab = [(a, b) for a in range(nb) for b in range(a, nb)]
    a_blk = jnp.asarray(np.array([p[0] for p in ab], dtype=np.int32))
    b_blk = jnp.asarray(np.array([p[1] for p in ab], dtype=np.int32))
    num_steps = len(ab)

    kernel = functools.partial(_ntxent_kernel, tb=tb, two_n=two_n,
                               inv_temp=inv_temp)

    out = pl.pallas_call(
        kernel,
        out_shape=jax.ShapeDtypeStruct((1, 1), jnp.float32),
        grid_spec=pltpu.PrefetchScalarGridSpec(
            num_scalar_prefetch=2,
            grid=(num_steps,),
            in_specs=[
                pl.BlockSpec((r, d), lambda t, a, b: (0, 0)),   # keys, resident
                pl.BlockSpec((n, 1), lambda t, a, b: (0, 0)),   # positives
            ],
            out_specs=pl.BlockSpec((1, 1), lambda t, a, b: (0, 0),
                                   memory_space=pltpu.MemorySpace.SMEM),
            scratch_shapes=[pltpu.VMEM((nb, tb), jnp.float32)],  # denominators
        ),
        compiler_params=pltpu.CompilerParams(
            dimension_semantics=("arbitrary",),
            vmem_limit_bytes=_vmem_limit_bytes(r, d, tb, nb, matmul_dtype),
        ),
    )(a_blk, b_blk, z_all, pos)
    return out[0, 0]


# --------------------------------------------------------------------------
# Plain-JAX reference mirroring the PyTorch module, for verification.
# --------------------------------------------------------------------------
def _reference_loss(emb_i, emb_j, temperature=0.5):
    n = emb_i.shape[0]
    z_i = emb_i / jnp.maximum(jnp.linalg.norm(emb_i, axis=1, keepdims=True), 1e-12)
    z_j = emb_j / jnp.maximum(jnp.linalg.norm(emb_j, axis=1, keepdims=True), 1e-12)
    reps = jnp.concatenate([z_i, z_j], axis=0)
    sim = jnp.matmul(reps, reps.T, precision=lax.Precision.HIGHEST)
    logits = sim / temperature
    exp_logits = jnp.exp(logits)
    two_n = 2 * n
    mask = 1.0 - jnp.eye(two_n)
    denom = jnp.sum(mask * exp_logits, axis=1)
    loss = 0.0
    for k in range(n):
        loss += (jnp.log(denom[k]) - logits[k, k + n]) + (
            jnp.log(denom[k + n]) - logits[k + n, k])
    return loss / two_n


if __name__ == "__main__":
    key = jax.random.PRNGKey(0)
    k1, k2 = jax.random.split(key)

    batch = 4          # module's batch_size (--batchsize default)
    dim = 32           # embedding dim
    temperature = 0.5  # module default

    emb_i = jax.random.normal(k1, (batch, dim), dtype=jnp.float32)
    emb_j = jax.random.normal(k2, (batch, dim), dtype=jnp.float32)

    ref = _reference_loss(emb_i, emb_j, temperature)

    # Exact mode (f32 MXU operands) -- must match the f32 reference tightly.
    loss_f32 = contrastive_loss_eli5(emb_i, emb_j, temperature=temperature,
                                     matmul_dtype=jnp.float32)
    loss_f32 = jax.block_until_ready(loss_f32)
    assert jnp.allclose(loss_f32, ref, rtol=1e-5, atol=1e-5), (loss_f32, ref)

    # Fast mode (bf16 MXU operands, the default) -- training-accuracy tolerance.
    loss_bf16 = contrastive_loss_eli5(emb_i, emb_j, temperature=temperature)
    loss_bf16 = jax.block_until_ready(loss_bf16)
    assert jnp.allclose(loss_bf16, ref, rtol=5e-2, atol=5e-2), (loss_bf16, ref)

    print("KERNEL_OK")
</pallas_src>

<mosaic_0001>
module attributes {stable_mosaic.version = 11 : i64} {
  func.func @_prep_kernel(%arg0: memref<4x32xf32, #tpu.memory_space<vmem>>, %arg1: memref<4x32xf32, #tpu.memory_space<vmem>>, %arg2: memref<2x4x32xf32, #tpu.memory_space<vmem>>, %arg3: memref<4x1xf32, #tpu.memory_space<vmem>>) attributes {dimension_semantics = [], scalar_prefetch = 0 : i64, scratch_operands = 0 : i64, tpu.core_type = #tpu.core_type<tc>} {
    %c0 = arith.constant 0 : index
    %c0_0 = arith.constant 0 : index
    %0 = vector.load %arg0[%c0, %c0_0] : memref<4x32xf32, #tpu.memory_space<vmem>>, vector<4x32xf32>
    %1 = arith.mulf %0, %0 : vector<4x32xf32>
    %cst = arith.constant dense<0.000000e+00> : vector<4xf32>
    %2 = vector.multi_reduction <add>, %1, %cst [1] : vector<4x32xf32> to vector<4xf32>
    %3 = vector.shape_cast %2 : vector<4xf32> to vector<4x1xf32>
    %cst_1 = arith.constant 1.000000e-24 : f32
    %4 = vector.broadcast %cst_1 : f32 to vector<4x1xf32>
    %5 = arith.maximumf %3, %4 : vector<4x1xf32>
    %6 = math.rsqrt %5 : vector<4x1xf32>
    %cst_2 = arith.constant 1.41421354 : f32
    %7 = vector.broadcast %cst_2 : f32 to vector<4x1xf32>
    %8 = arith.mulf %6, %7 : vector<4x1xf32>
    %9 = vector.broadcast %8 : vector<4x1xf32> to vector<4x32xf32>
    %10 = arith.mulf %0, %9 : vector<4x32xf32>
    %c0_3 = arith.constant 0 : index
    %c0_4 = arith.constant 0 : index
    %11 = vector.load %arg1[%c0_3, %c0_4] : memref<4x32xf32, #tpu.memory_space<vmem>>, vector<4x32xf32>
    %12 = arith.mulf %11, %11 : vector<4x32xf32>
    %cst_5 = arith.constant dense<0.000000e+00> : vector<4xf32>
    %13 = vector.multi_reduction <add>, %12, %cst_5 [1] : vector<4x32xf32> to vector<4xf32>
    %14 = vector.shape_cast %13 : vector<4xf32> to vector<4x1xf32>
    %cst_6 = arith.constant 1.000000e-24 : f32
    %15 = vector.broadcast %cst_6 : f32 to vector<4x1xf32>
    %16 = arith.maximumf %14, %15 : vector<4x1xf32>
    %17 = math.rsqrt %16 : vector<4x1xf32>
    %cst_7 = arith.constant 1.41421354 : f32
    %18 = vector.broadcast %cst_7 : f32 to vector<4x1xf32>
    %19 = arith.mulf %17, %18 : vector<4x1xf32>
    %20 = vector.broadcast %19 : vector<4x1xf32> to vector<4x32xf32>
    %21 = arith.mulf %11, %20 : vector<4x32xf32>
    %c0_8 = arith.constant 0 : index
    %c0_9 = arith.constant 0 : index
    %c0_10 = arith.constant 0 : index
    %22 = vector.load %arg2[%c0_8, %c0_9, %c0_10] : memref<2x4x32xf32, #tpu.memory_space<vmem>>, vector<1x4x32xf32>
    %23 = vector.shape_cast %22 : vector<1x4x32xf32> to vector<4x32xf32>
    %24 = vector.shape_cast %10 : vector<4x32xf32> to vector<1x4x32xf32>
    tpu.vector_store %arg2[%c0_8, %c0_9, %c0_10], %24 {strides = array<i32>} : memref<2x4x32xf32, #tpu.memory_space<vmem>>, vector<1x4x32xf32>,
    %c1 = arith.constant 1 : index
    %c0_11 = arith.constant 0 : index
    %c0_12 = arith.constant 0 : index
    %25 = vector.load %arg2[%c1, %c0_11, %c0_12] : memref<2x4x32xf32, #tpu.memory_space<vmem>>, vector<1x4x32xf32>
    %26 = vector.shape_cast %25 : vector<1x4x32xf32> to vector<4x32xf32>
    %27 = vector.shape_cast %21 : vector<4x32xf32> to vector<1x4x32xf32>
    tpu.vector_store %arg2[%c1, %c0_11, %c0_12], %27 {strides = array<i32>} : memref<2x4x32xf32, #tpu.memory_space<vmem>>, vector<1x4x32xf32>,
    %28 = arith.mulf %10, %21 : vector<4x32xf32>
    %cst_13 = arith.constant dense<0.000000e+00> : vector<4xf32>
    %29 = vector.multi_reduction <add>, %28, %cst_13 [1] : vector<4x32xf32> to vector<4xf32>
    %30 = vector.shape_cast %29 : vector<4xf32> to vector<4x1xf32>
    %c0_14 = arith.constant 0 : index
    %c0_15 = arith.constant 0 : index
    %31 = vector.load %arg3[%c0_14, %c0_15] : memref<4x1xf32, #tpu.memory_space<vmem>>, vector<4x1xf32>
    tpu.vector_store %arg3[%c0_14, %c0_15], %30 {strides = array<i32>} : memref<4x1xf32, #tpu.memory_space<vmem>>, vector<4x1xf32>,
    return
  }
}

</mosaic_0001>

<bundles_post_ra>
// kernel: tpu_custom_call.1
= control target key start
LH: loop header
LB: loop body
LE: loop exit
PB: predicated region body
PF: predicated region fallthrough
CT: control target
= control target key end

     0   :  { %9 = vsyncpa [#allocation3], 0  ;;  %s205_s0 = inlined_call_operand.hbm [shape: f32[4,32], index: 0, kind: input, shape index: {}]   ;;  %s206_s1 = inlined_call_operand.hbm [shape: f32[4,32], index: 1, kind: input, shape index: {}]   ;;  %s207_s2 = inlined_call_operand.hbm [shape: f32[2,4,32], index: 2, kind: output, shape index: {0}]   ;;  %s208_s3 = inlined_call_operand.vmem [shape: f32[4,1], index: 3, kind: output, shape index: {1}]  }
   0x1   :  { %10 = vsyncpa [#allocation6], 0 }
   0x2   :  { %11 = vsyncpa [#allocation4], 0  ;;  %s163_s12 = smov [#allocation2]   ;;  %s164_s14 = smov [#allocation5]  }
   0x3   :  { %s18_s13 = sshll.u32 %s163_s12, 4  ;;  %s28_s15 = sshll.u32 %s164_s14, 4  ;;  %s19_s13 = int_to_ptr.vmem [resolvable:$true] %s18_s13  ;;  %s29_s15 = int_to_ptr.vmem [resolvable:$true] %s28_s15 }
   0x4   :  { %s105_s16 = scalar_lea.vmem %s19_s13, 64  ;;  %p110_p1 = scmp.lt.s32.totalorder %s19_s13, %s19_s13 }
   0x5   :  { %p106_p0 = scmp.ne.s32.totalorder %s19_s13, %s105_s16  ;;  %p111_p2 = scmp.lt.s32.totalorder %s105_s16, %s105_s16 }
   0x7   :  { %p112_p3 = por %p111_p2, %p110_p1 }
   0x9   :  { %p113_p4 = pnand %p112_p3, %p106_p0 }
   0xb   :  { %116 = shalt.err (!%p113_p4)
}
   0xc   :  { %21 = dma.hbm_to_vmem [thread:$0]  %s205_s0, 64, %s19_s13, [#allocation3]  }
   0xd   :  { %s125_s19 = scalar_lea.vmem %s29_s15, 64  ;;  %p130_p6 = scmp.lt.s32.totalorder %s29_s15, %s29_s15 }
   0xe   :  { %p126_p5 = scmp.ne.s32.totalorder %s29_s15, %s125_s19  ;;  %p131_p7 = scmp.lt.s32.totalorder %s125_s19, %s125_s19 }
  0x10   :  { %p132_p8 = por %p131_p7, %p130_p6 }
  0x12   :  { %p133_p9 = pnand %p132_p8, %p126_p5 }
  0x14   :  { %136 = shalt.err (!%p133_p9)
}
  0x15   :  { %31 = dma.hbm_to_vmem [thread:$0]  %s206_s1, 64, %s29_s15, [#allocation6]  }
  0x16   :  { %157 = dma.done.wait [#allocation3], 64  }
  0x17   :  { %158 = vsyncadd [#allocation3], 4294967232 }
  0x18   :  { %159 = dma.done.wait [#allocation6], 64  }
  0x19   :  { %160 = vsyncadd [#allocation6], 4294967232  ;;  %v38_v0 = vld [vmem:[#allocation2] sm:$0xf]  ;;  %vm40_vm0 = vcmask 257024   ;;  %s165_s0 = smov [#allocation7]  }
  0x1a   :  { %v48_v1 = vld [vmem:[#allocation5] sm:$0xf]  ;;  %v39_v2 = vmul.f32 %v38_v0, %v38_v0  ;;  %s71_s1 = sshll.u32 %s165_s0, 4  ;;  %s72_s1 = int_to_ptr.vmem [resolvable:$true] %s71_s1 }
  0x1b   :  { %v49_v3 = vmul.f32 %v48_v1, %v48_v1  ;;  %s137_s22 = scalar_lea.vmem %s72_s1, 128  ;;  %p142_p11 = scmp.lt.s32.totalorder %s72_s1, %s72_s1 }
  0x1c   :  { %v41_v4 = vsel %vm40_vm0, %v39_v2, 0.0  ;;  %p138_p10 = scmp.ne.s32.totalorder %s72_s1, %s137_s22  ;;  %p143_p12 = scmp.lt.s32.totalorder %s137_s22, %s137_s22 }
  0x1d   :  { %42 = vadd.xlane.f32.xlu0 %v41_v4  ;;  %v50_v5 = vsel %vm40_vm0, %v49_v3, 0.0 }
  0x1e   :  { %p144_p13 = por %p143_p12, %p142_p11 }
  0x20   :  { %p145_p0 = pnand %p144_p13, %p138_p10 }
  0x21   :  { %51 = vadd.xlane.f32.xlu0 %v50_v5 }
  0xa6   :  { %v43_v6 = vpop.xlane.xlu0 %42 }
  0xa7   :  { %v44_v7 = vmax.f32 %v43_v6, 1e-24 }
  0xa9   :  { %93 = vrsqrt.f32 %v44_v7 }
  0xaa   :  { %v52_v8 = vpop.xlane.xlu0 %51 }
  0xab   :  { %v53_v9 = vmax.f32 %v52_v8, 1e-24 }
  0xad   :  { %95 = vrsqrt.f32 %v53_v9 }
  0xb6   :  { %v94_v10 = vpop.eup %93 }
  0xb7   :  { %v46_v11 = vmul.f32 1.4142135, %v94_v10 }
  0xb9   :  { %v47_v12 = vmul.f32 %v46_v11, %v38_v0 }
  0xba   :  { %v96_v13 = vpop.eup %95 }
  0xbb   :  { %v55_v14 = vmul.f32 1.4142135, %v96_v13  ;;  %57 = vst.msk [vmem:[#allocation7] sm:$0xf] %vm40_vm0, %v47_v12 }
  0xbd   :  { %v56_v15 = vmul.f32 %v55_v14, %v48_v1 }
  0xbf   :  { %v60_v16 = vmul.f32 %v56_v15, %v47_v12  ;;  %59 = vst.msk [vmem:[#allocation7 + $0x4] sm:$0xf] %vm40_vm0, %v56_v15 }
  0xc1   :  { %v61_v17 = vsel %vm40_vm0, %v60_v16, 0.0 }
  0xc2   :  { %62 = vadd.xlane.f32.xlu1 %v61_v17 }
  0xc3   :  { %148 = shalt.err (!%p145_p0)
}
  0xc4   :  { %s166_s23 = smov 64   ;;  %s167_s24 = smov 4   ;;  %vm64_vm1 = vcmask 3072  }
  0xc5   :  { %77 = dma.vmem_to_hbm [thread:$0]  %s72_s1, 128, %s207_s2, [#allocation4], %s166_s23, %s166_s23, %s167_s24  }
 0x14b   :  { %v63_v18 = vpop.xlane.xlu1 %62 }
 0x14c   :  { %65 = vst.msk [vmem:[%s208_s3] sm:$0xf] %vm64_vm1, %v63_v18 }
 0x14d   :  { %161 = dma.done.wait [#allocation4], 128  }
 0x14e   :  { %162 = vsyncadd [#allocation4], 4294967168 }
 0x14f   :  { %85 = vsyncpa [#allocation3], 1 }
 0x150   :  { %86 = vsyncpa [#allocation6], 1 }
 0x151   :  { %87 = vsyncpa [#allocation4], 1 }

</bundles_post_ra>
